<compile_context>
chip_gen: v7x
topology: tpu7x:2x2x1
jax: 0.10.0
libtpu: 0.0.40
codegen_flags: <defaults>
</compile_context>

<pallas_src>
import functools

import jax
import jax.numpy as jnp
from jax import lax
from jax.experimental import pallas as pl
from jax.experimental.pallas import tpu as pltpu


def _dropout_kernel(seed_ref, x_ref, o_ref, *, nbc, hw, threshold, keep_scale,
                    use_hw_prng):
    """One grid step handles an (nbc, tt, hw) slab of x.

    The Bernoulli mask has shape (nbc, hw) — one value per (b*c, spatial)
    location — and is broadcast over the time axis, matching the PyTorch mask
    of shape (B, C, 1, H, W). The mask depends only on the row-block index
    (program_id(0)), so time-axis blocks of the same rows reuse the same mask.
    """
    i = pl.program_id(0)

    if use_hw_prng:
        # Hardware PRNG: one op generates a vreg of bits; deterministic per
        # (seed, row-block) so megacore sharding does not change the mask.
        pltpu.prng_seed(seed_ref[0], i)
        rpad = ((nbc + 7) // 8) * 8       # sublane-aligned generation shape
        cpad = ((hw + 127) // 128) * 128  # lane-aligned generation shape
        bits = pltpu.prng_random_bits((rpad, cpad))
        bits = bits.astype(jnp.uint32)[:nbc, :hw]  # same-width wrap == bitcast
    else:
        # Counter-based splitmix32-style hash over global (row, col) indices
        # (fallback path; lowers everywhere including interpret mode).
        rows = lax.broadcasted_iota(jnp.int32, (nbc, hw), 0) + i * nbc
        cols = lax.broadcasted_iota(jnp.int32, (nbc, hw), 1)
        h = (rows * hw + cols).astype(jnp.uint32)
        h = h ^ (seed_ref[0].astype(jnp.uint32) * jnp.uint32(0x9E3779B1))
        h = h ^ (h >> jnp.uint32(16))
        h = h * jnp.uint32(0x7FEB352D)
        h = h ^ (h >> jnp.uint32(15))
        h = h * jnp.uint32(0x846CA68B)
        bits = h ^ (h >> jnp.uint32(16))

    xv = x_ref[...]
    # Inverted dropout: keep w.p. (1-p) scaled by 1/(1-p), else 0. Integer
    # threshold compare on raw uint32 bits; mask built in the input dtype so
    # bf16 inputs multiply natively (no f32 round trip).
    mask = jnp.where(bits >= jnp.uint32(threshold),
                     jnp.asarray(keep_scale, xv.dtype),
                     jnp.asarray(0, xv.dtype))
    o_ref[...] = xv * mask[:, None, :]


def _plan_blocks(bc, t, hw, itemsize, target_bytes=2 << 20):
    """Pick (rows-per-block, time-per-block) giving ~1-4 MiB streaming blocks.

    Not restricted to divisors of bc: the grid uses cdiv and Pallas masks the
    remainder block. Caps rows-per-block at ceil(bc/2) so there are >= 2 grid
    steps for megacore whenever possible, and nudges odd grids even.
    """
    lane = ((hw + 127) // 128) * 128

    def slab_bytes(nbc, tt):
        return nbc * (((tt + 7) // 8) * 8) * lane * itemsize

    if slab_bytes(1, t) <= target_bytes:
        tt = t
        nbc = int(min(max(1, target_bytes // slab_bytes(1, t)), bc))
    else:
        # A single (b*c) row is already big: split the time axis instead.
        nbc = 1
        tt = max(8, (target_bytes // slab_bytes(1, 8)) * 8)
        tt = int(min(tt, t))

    if bc >= 2:
        nbc = min(nbc, -(-bc // 2))          # guarantee >= 2 row blocks
        gb = -(-bc // nbc)
        if gb > 1 and gb % 2 == 1:           # best-effort even grid for 2 TCs
            alt = -(-bc // (gb + 1))
            if alt >= 1 and (-(-bc // alt)) % 2 == 0:
                nbc = alt
    return nbc, tt


def dropout_layer_forward(x, seed, *, rem_prob=0.5, training=True):
    """Pallas implementation of DropoutLayer.forward (after_conv / Nodes).

    x: (B, C, T, H, W) float array. Returns (output, loss) like the module.
    """
    B, C, T, H, W = x.shape
    loss = jnp.zeros((), x.dtype)  # 0 * x.mean() is identically zero.

    p = float(rem_prob)
    if not training or p <= 0.0:
        return x, loss
    if p >= 1.0:
        # Everything dropped; 1/(1-p) undefined — return zeros like PyTorch.
        return jnp.zeros_like(x), loss

    BC, HW = B * C, H * W
    x2 = x.reshape(BC, T, HW)                # metadata-only reshape, no pad
    itemsize = jnp.dtype(x.dtype).itemsize

    nbc, tt = _plan_blocks(BC, T, HW, itemsize)
    gb = -(-BC // nbc)
    gt = -(-T // tt)

    threshold = min(int(round(p * 2.0 ** 32)), 2 ** 32 - 1)
    keep_scale = 1.0 / (1.0 - p)
    use_hw_prng = jax.default_backend() == "tpu"

    kernel = functools.partial(
        _dropout_kernel, nbc=nbc, hw=HW,
        threshold=threshold, keep_scale=keep_scale, use_hw_prng=use_hw_prng)

    # Scoped-VMEM budget: in+out double-buffered blocks plus headroom. Cap at
    # 48 MiB so it also fits v7x's 64 MiB physical VMEM per TensorCore.
    lane = ((HW + 127) // 128) * 128
    block_bytes = nbc * (((tt + 7) // 8) * 8) * lane * itemsize
    cp_kwargs = dict(dimension_semantics=("parallel", "parallel"))
    needed = 4 * block_bytes + (4 << 20)
    if needed > (16 << 20):
        cp_kwargs["vmem_limit_bytes"] = min(needed, 48 << 20)

    total = BC * T * HW
    cost = pl.CostEstimate(flops=total, transcendentals=0,
                           bytes_accessed=2 * total * itemsize)

    seed_arr = jnp.array([seed], dtype=jnp.int32)

    out2 = pl.pallas_call(
        kernel,
        out_shape=jax.ShapeDtypeStruct((BC, T, HW), x.dtype),
        grid_spec=pltpu.PrefetchScalarGridSpec(
            num_scalar_prefetch=1,
            grid=(gb, gt),
            # Trailing (tt, HW) dims are either (8,128)-aligned or full-extent,
            # so non-128-aligned H*W is handled by masked loads/stores in-kernel
            # instead of wrapper-side pad/slice HBM round trips.
            in_specs=[pl.BlockSpec((nbc, tt, HW), lambda i, j, s: (i, j, 0))],
            out_specs=pl.BlockSpec((nbc, tt, HW), lambda i, j, s: (i, j, 0)),
        ),
        compiler_params=pltpu.CompilerParams(**cp_kwargs),
        cost_estimate=cost,
    )(seed_arr, x2)

    output = out2.reshape(B, C, T, H, W)
    # flatten_output=False -> output returned in the input layout.
    return output, loss


if __name__ == "__main__":
    key = jax.random.PRNGKey(0)
    # Small shapes consistent with "after_conv": (batch, channels, steps, H, W)
    B, C, T, H, W = 2, 4, 8, 16, 16
    x = jax.random.normal(key, (B, C, T, H, W), dtype=jnp.float32)

    out, loss = dropout_layer_forward(x, seed=1234, rem_prob=0.5, training=True)
    out = jax.block_until_ready(out)
    loss = jax.block_until_ready(loss)

    assert out.shape == x.shape
    assert float(loss) == 0.0

    # Light sanity checks on dropout semantics (not asserts on exact RNG):
    #  - every output element is either 0 or x * 1/(1-p)
    #  - mask is constant along the time axis
    #  - keep fraction is roughly 1-p
    ratio = jnp.where(x != 0, out / x, 0.0)
    ok_vals = bool(jnp.all((jnp.abs(ratio) < 1e-5) | (jnp.abs(ratio - 2.0) < 1e-4)))
    ok_time = bool(jnp.all(jnp.abs(ratio - ratio[:, :, :1]) < 1e-4))
    keep_frac = float(jnp.mean((jnp.abs(ratio[:, :, 0]) > 1.0).astype(jnp.float32)))
    assert ok_vals and ok_time
    assert 0.2 < keep_frac < 0.8

    print("KERNEL_OK")
</pallas_src>

<mosaic_0001>
module attributes {stable_mosaic.version = 11 : i64} {
  func.func @_dropout_kernel(%arg0: i32, %arg1: i32, %arg2: memref<1xi32, #tpu.memory_space<smem>>, %arg3: memref<4x8x256xf32, #tpu.memory_space<vmem>>, %arg4: memref<4x8x256xf32, #tpu.memory_space<vmem>>) attributes {dimension_semantics = [#tpu.dimension_semantics<parallel>, #tpu.dimension_semantics<parallel>], iteration_bounds = array<i64: 2, 1>, scalar_prefetch = 1 : i64, scratch_operands = 0 : i64, tpu.core_type = #tpu.core_type<tc>, window_params = [{transform_indices = @transform_0, window_bounds = array<i64: 4, 8, 256>}, {transform_indices = @transform_1, window_bounds = array<i64: 4, 8, 256>}]} {
    %0 = tpu.iota {dimensions = array<i32: 0>} : vector<4x256xi32>
    %c4_i32 = arith.constant 4 : i32
    %1 = arith.muli %arg0, %c4_i32 : i32
    %2 = vector.broadcast %1 : i32 to vector<4x256xi32>
    %3 = arith.addi %0, %2 : vector<4x256xi32>
    %4 = tpu.iota {dimensions = array<i32: 1>} : vector<4x256xi32>
    %c256_i32 = arith.constant 256 : i32
    %5 = vector.broadcast %c256_i32 : i32 to vector<4x256xi32>
    %6 = arith.muli %3, %5 : vector<4x256xi32>
    %7 = arith.addi %6, %4 : vector<4x256xi32>
    %c0 = arith.constant 0 : index
    %8 = memref.load %arg2[%c0] : memref<1xi32, #tpu.memory_space<smem>>
    %c-1640531535_i32 = arith.constant -1640531535 : i32
    %9 = arith.muli %8, %c-1640531535_i32 : i32
    %10 = vector.broadcast %9 : i32 to vector<4x256xi32>
    %11 = arith.xori %7, %10 : vector<4x256xi32>
    %c16_i32 = arith.constant 16 : i32
    %12 = vector.broadcast %c16_i32 : i32 to vector<4x256xi32>
    %13 = arith.shrui %11, %12 : vector<4x256xi32>
    %14 = arith.xori %11, %13 : vector<4x256xi32>
    %c2146121005_i32 = arith.constant 2146121005 : i32
    %15 = vector.broadcast %c2146121005_i32 : i32 to vector<4x256xi32>
    %16 = arith.muli %14, %15 : vector<4x256xi32>
    %c15_i32 = arith.constant 15 : i32
    %17 = vector.broadcast %c15_i32 : i32 to vector<4x256xi32>
    %18 = arith.shrui %16, %17 : vector<4x256xi32>
    %19 = arith.xori %16, %18 : vector<4x256xi32>
    %c-2073254261_i32 = arith.constant -2073254261 : i32
    %20 = vector.broadcast %c-2073254261_i32 : i32 to vector<4x256xi32>
    %21 = arith.muli %19, %20 : vector<4x256xi32>
    %c16_i32_0 = arith.constant 16 : i32
    %22 = vector.broadcast %c16_i32_0 : i32 to vector<4x256xi32>
    %23 = arith.shrui %21, %22 : vector<4x256xi32>
    %24 = arith.xori %21, %23 : vector<4x256xi32>
    %c0_1 = arith.constant 0 : index
    %c0_2 = arith.constant 0 : index
    %c0_3 = arith.constant 0 : index
    %25 = vector.load %arg3[%c0_1, %c0_2, %c0_3] : memref<4x8x256xf32, #tpu.memory_space<vmem>>, vector<4x8x256xf32>
    %c-2147483648_i32 = arith.constant -2147483648 : i32
    %26 = vector.broadcast %c-2147483648_i32 : i32 to vector<4x256xi32>
    %27 = arith.cmpi uge, %24, %26 : vector<4x256xi32>
    %cst = arith.constant 2.000000e+00 : f32
    %cst_4 = arith.constant 0.000000e+00 : f32
    %28 = vector.broadcast %cst : f32 to vector<4x256xf32>
    %29 = vector.broadcast %cst_4 : f32 to vector<4x256xf32>
    %30 = arith.select %27, %28, %29 : vector<4x256xi1>, vector<4x256xf32>
    %31 = vector.shape_cast %30 : vector<4x256xf32> to vector<4x1x256xf32>
    %32 = vector.broadcast %31 : vector<4x1x256xf32> to vector<4x8x256xf32>
    %33 = arith.mulf %25, %32 : vector<4x8x256xf32>
    %c0_5 = arith.constant 0 : index
    %c0_6 = arith.constant 0 : index
    %c0_7 = arith.constant 0 : index
    %34 = vector.load %arg4[%c0_5, %c0_6, %c0_7] : memref<4x8x256xf32, #tpu.memory_space<vmem>>, vector<4x8x256xf32>
    tpu.vector_store %arg4[%c0_5, %c0_6, %c0_7], %33 {strides = array<i32>} : memref<4x8x256xf32, #tpu.memory_space<vmem>>, vector<4x8x256xf32>,
    return
  }
  func.func @transform_0(%arg0: i32, %arg1: i32, %arg2: memref<1xi32, #tpu.memory_space<smem>>) -> (i32, i32, i32) {
    %c0_i32 = arith.constant 0 : i32
    %c0_i32_0 = arith.constant 0 : i32
    return %arg0, %arg1, %c0_i32 : i32, i32, i32
  }
  func.func @transform_1(%arg0: i32, %arg1: i32, %arg2: memref<1xi32, #tpu.memory_space<smem>>) -> (i32, i32, i32) {
    %c0_i32 = arith.constant 0 : i32
    %c0_i32_0 = arith.constant 0 : i32
    return %arg0, %arg1, %c0_i32 : i32, i32, i32
  }
}

</mosaic_0001>

<bundles_post_ra>
// kernel: tpu_custom_call.1
= control target key start
LH: loop header
LB: loop body
LE: loop exit
PB: predicated region body
PF: predicated region fallthrough
CT: control target
= control target key end

     0   :  { %s820_s0 = inlined_call_operand.<no memory space> [shape: s32[1], index: 0, kind: input, shape index: {}]   ;;  %s821_s1 = inlined_call_operand.hbm [shape: f32[8,8,256], index: 1, kind: input, shape index: {}]   ;;  %s822_s2 = inlined_call_operand.hbm [shape: f32[8,8,256], index: 2, kind: output, shape index: {}]  }
   0x1   :  { %7 = sst [smem:[#allocation3]] %s820_s0 }
   0x2   :  { %8 = vsyncpa [#allocation5], 0 }
   0x3   :  { %10 = vsyncpa [#allocation5 + $0x1], 0 }
   0x4   :  { %11 = vsyncpa [#allocation6], 0 }
   0x5   :  { %13 = vsyncpa [#allocation6 + $0x1], 0  ;;  %s619_s11 = smov 0   ;;  %s621_s12 = smov 0  }
   0x6   :  { %s623_s13 = smov 0   ;;  %s625_s14 = smov 0  }
   0x7   :  { %s627_s15 = smov 0   ;;  %s629_s16 = smov 0  }
   0x8 LB: > { %s389_s0 = sadd.s32 4294967295, %s591_s16   ;;  %s390_s17 = sadd.s32 4294967294, %s591_s16   ;;  %s591_s16 = sphi %s629_s16, %s19_s16   ;;  %s587_s15 = sphi %s627_s15, %s837_s15   ;;  %s583_s14 = sphi %s625_s14, %s836_s14   ;;  %s579_s13 = sphi %s623_s13, %s835_s13   ;;  %s575_s12 = sphi %s621_s12, %s834_s12   ;;  %s571_s11 = sphi %s619_s11, %s833_s11  }
   0x9   : > { %s31_s18 = sadd.s32 1, %s587_s15  ;;  %s40_s19 = sadd.s32 1, %s579_s13 }
   0xa   : > { %p33_p0 = scmp.ge.s32.totalorder %s31_s18, 2  ;;  %p47_p1 = scmp.ne.s32.totalorder %s579_s13, %s575_s12 }
   0xb   : > { %p48_p2 = scmp.eq.s32.totalorder %s591_s16, 0  ;;  %p53_p3 = scmp.ne.s32.totalorder %s575_s12, %s571_s11 }
   0xc   : > { %s839_s18 = smov (%p33_p0, %s31_s18), 0  ;;  %p54_p5 = scmp.eq.s32.totalorder %s389_s0, 0 }
   0xd   : > { %p660_p4 = por %p48_p2, %p47_p1  ;;  %s35_s21 = ssub.s32 %s587_s15, %s839_s18 }
   0xe   : > { %p79_p6 = scmp.eq.s32.totalorder %s389_s0, 1  ;;  %p38_p7 = scmp.eq.s32.totalorder %s35_s21, 0 }
   0xf   : > { %p666_p8 = por %p54_p5, %p53_p3  ;;  %p85_p10 = scmp.eq.s32.totalorder %s390_s17, 1 }
  0x10   : > { %p670_p9 = por %p79_p6, %p47_p1  ;;  %p423_p13 = scmp.lt.s32.totalorder %s591_s16, 2 }
  0x11   : > { %s675_s24 = scalar_select %p38_p7, %s579_s13, %s40_s19  }
  0x12   : > { %s826_s23 = scalar_select %p670_p9, 1, 0 }
  0x13   : > { %p677_p11 = por %p85_p10, %p53_p3  ;;  %s105_s26 = sand.u32 1, %s579_s13  }
  0x14   : > { %s393_s27 = sshll.u32 %s105_s26, 6  ;;  %s408_s28 = sshll.u32 %s587_s15, 10 }
  0x15   : > { %s827_s25 = scalar_select %p677_p11, 1, 0 }
  0x16   : > { %s688_s3 = scalar_lea.hbm %s821_s1, %s408_s28  ;;  %s109_s4 = scalar_lea.vmem [#allocation4], %s393_s27 }
  0x17   : > { %s119_s5 = sshll.u32 %s109_s4, 4  ;;  %p694_p0 = pnand %p423_p13, %p660_p4  ;;  %s690_s5 = int_to_ptr.vmem [resolvable:$true] %s119_s5 }
  0x18   : > { %s699_s7 = scalar_lea.sflag [#allocation5], %s105_s26  ;;  %s479_s8 = scalar_lea.hbm %s688_s3, 1024 }
  0x19   : > { %p480_p2 = scmp.ne.s32.totalorder %s688_s3, %s479_s8  ;;  %p481_p3 = pneg %p694_p0 }
  0x1a   : > { %s484_s0 = scalar_lea.hbm %s821_s1, 2048  ;;  %p485_p4 = scmp.lt.u32.totalorder %s688_s3, %s821_s1 }
  0x1b   : > { %p482_p5 = pnand %p481_p3, %p480_p2  ;;  %p486_p7 = scmp.lt.u32.totalorder %s484_s0, %s479_s8 }
  0x1c   : > { %p488_p13 = scmp.lt.u32.totalorder %s479_s8, %s688_s3 }
  0x1d   : > { %p483_p6 = pneg %p482_p5  ;;  %p487_p10 = por %p486_p7, %p485_p4 }
  0x1f   : > { %p489_p12 = por %p488_p13, %p487_p10 }
  0x21   : > { %p490_p1 = pnand %p489_p12, %p483_p6 }
  0x23   : > { %493 = shalt.err (!%p490_p1)
}
  0x24   : > { %s494_s20 = scalar_lea.vmem %s690_s5, 1024  ;;  %s593_s21 = smov [#allocation4]  }
  0x25   : > { %p495_p2 = scmp.ne.s32.totalorder %s690_s5, %s494_s20  ;;  %s499_s26 = sshll.u32 %s593_s21, 4  ;;  %s500_s26 = int_to_ptr.vmem [resolvable:$false] %s499_s26 }
  0x26   : > { %s501_s27 = scalar_lea.vmem %s500_s26, 2048  ;;  %p502_p9 = scmp.lt.s32.totalorder %s690_s5, %s500_s26 }
  0x27   : > { %p497_p5 = pnand %p495_p2, %p481_p3  ;;  %p503_p4 = scmp.lt.s32.totalorder %s501_s27, %s494_s20 }
  0x29   : > { %p498_p11 = pneg %p497_p5  ;;  %p504_p7 = por %p503_p4, %p502_p9 }
  0x2b   : > { %p505_p10 = pnand %p504_p7, %p498_p11 }
  0x2d   : > { %508 = shalt.err (!%p505_p10)
}
  0x2e   : > { %s594_s28 = smov 256   ;;  %s595_s29 = smov 16  }
  0x2f   : > { %418 = dma.hbm_to_vmem [thread:$0]  (!%p694_p0), %s688_s3, 1024, %s690_s5, %s699_s7, %s594_s28, %s594_s28, %s595_s29  }
  0x30   : > { %p127_p12 = scmp.lt.s32.totalorder %s591_s16, 3  ;;  %p829_p1 = scmp.ge.s32.totalorder %s591_s16, 1 }
  0x32   : > { %p128_p3 = pnand %p829_p1, %p127_p12 }
  0x33   : > { %s731_s30 = sand.u32 (!%p128_p3), 1, %s575_s12  }
  0x34   : > { %131 = sbr.rel (%p128_p3) target bundleno = 120 (0x78), region = 24  ;;  %s398_s4 = sshll.u32 (!%p128_p3), %s731_s30, 6 }
  0x35   : > { %s134_s8 = scalar_lea.sflag (!%p128_p3), [#allocation5], %s731_s30  ;;  %s737_s9 = scalar_lea.vmem (!%p128_p3), [#allocation4], %s398_s4 }
  0x3b   : > { %562 = dma.done.wait (%p666_p8), %s134_s8, 1024  }
  0x3c   : > { %564 = vsyncadd (%p666_p8), %s134_s8, 4294966272  ;;  %v158_v0 = vlaneseq  ;;  %s400_s3 = sshll.u32 %s583_s14, 2  ;;  %s169_s5 = sld [smem:[#allocation3]]  ;;  %v596_v22 = vmov 1966171168   ;;  %v597_v32 = vmov 0.0  }
  0x3d   : > { %v161_v1 = vstv %s400_s3  ;;  %v206_v23 = vunpack.c.l.s4 %v596_v22  ;;  %v190_v41 = vld [vmem:[%s737_s9] sm:$0xff]  ;;  %v191_v42 = vld [vmem:[%s737_s9 + $0x8] sm:$0xff]  ;;  %v192_v47 = vld [vmem:[%s737_s9 + $0x10] sm:$0xff]  ;;  %s750_s22 = scalar_lea.vmem [#allocation7], %s398_s4  ;;  %s410_s10 = sshll.u32 %s583_s14, 10 }
  0x3e   : > { %v159_v2 = vshrl.u32 %v158_v0, 7  ;;  %v164_v3 = vand.u32 127, %v158_v0  ;;  %v193_v48 = vld [vmem:[%s737_s9 + $0x18] sm:$0xff]  ;;  %s302_s7 = sshll.u32 %s750_s22, 4  ;;  %v194_v53 = vld [vmem:[%s737_s9 + $0x20] sm:$0xff]  ;;  %v195_v54 = vld [vmem:[%s737_s9 + $0x28] sm:$0xff]  ;;  %s769_s14 = scalar_lea.hbm %s822_s2, %s410_s10  ;;  %s760_s7 = int_to_ptr.vmem [resolvable:$true] %s302_s7 }
  0x3f   : > { %v207_v28 = vunpack.c.0.s8 %v206_v23  ;;  %v196_v60 = vld [vmem:[%s737_s9 + $0x30] sm:$0xff]  ;;  %v197_v61 = vld [vmem:[%s737_s9 + $0x38] sm:$0xff]  ;;  %s286_s19 = scalar_lea.sflag [#allocation6], %s731_s30  ;;  %s509_s20 = scalar_lea.vmem %s760_s7, 1024 }
  0x40   : > { %v162_v4 = vadd.s32 %v161_v1, %v159_v2  ;;  %v165_v5 = vadd.s32 128, %v164_v3  ;;  %v231_v37 = vsub.s32 0, %v159_v2  ;;  %v235_v38 = vsub.s32 1, %v159_v2  ;;  %p510_p8 = scmp.ne.s32.totalorder %s760_s7, %s509_s20  ;;  %p830_p9 = scmp.ne.s32.totalorder %s826_s23, 0 }
  0x41   : > { %v210_v31 = vsub.s32 %v207_v28, %v159_v2  ;;  %s598_s21 = smov [#allocation7]  }
  0x42   : > { %v166_v6 = vmul.u32 256, %v162_v4  ;;  %s170_s6 = smul.u32 2654435761, %s169_s5  ;;  %p511_p11 = pnand %p510_p8, %p830_p9 }
  0x43   : > { %s513_s26 = sshll.u32 %s598_s21, 4  ;;  %s514_s26 = int_to_ptr.vmem [resolvable:$false] %s513_s26 }
  0x44   : > { %v167_v7 = vadd.s32 %v166_v6, %v164_v3  ;;  %v168_v8 = vadd.s32 %v166_v6, %v165_v5  ;;  %v171_v9 = vstv %s170_s6  ;;  %p512_p0 = pneg %p511_p11  ;;  %s515_s27 = scalar_lea.vmem %s514_s26, 2048 }
  0x45   : > { %p516_p6 = scmp.lt.s32.totalorder %s760_s7, %s514_s26  ;;  %p517_p13 = scmp.lt.s32.totalorder %s515_s27, %s509_s20 }
  0x46   : > { %v172_v10 = vxor.u32 %v171_v9, %v167_v7  ;;  %v173_v11 = vxor.u32 %v171_v9, %v168_v8 }
  0x47   : > { %p518_p2 = por %p517_p13, %p516_p6 }
  0x48   : > { %v174_v12 = vshrl.u32 %v172_v10, 16  ;;  %v175_v13 = vshrl.u32 %v173_v11, 16 }
  0x49   : > { %p519_p5 = pnand %p518_p2, %p512_p0 }
  0x4a   : > { %v176_v14 = vxor.u32 %v174_v12, %v172_v10  ;;  %v177_v15 = vxor.u32 %v175_v13, %v173_v11 }
  0x4c   : > { %v178_v16 = vmul.u32 2146121005, %v176_v14  ;;  %v179_v17 = vmul.u32 2146121005, %v177_v15 }
  0x4e   : > { %v180_v18 = vshrl.u32 %v178_v16, 15  ;;  %v181_v19 = vshrl.u32 %v179_v17, 15 }
  0x50   : > { %v182_v20 = vxor.u32 %v180_v18, %v178_v16  ;;  %v183_v21 = vxor.u32 %v181_v19, %v179_v17 }
  0x52   : > { %v184_v24 = vmul.u32 2221713035, %v182_v20  ;;  %v185_v25 = vmul.u32 2221713035, %v183_v21 }
  0x54   : > { %v186_v26 = vshrl.u32 %v184_v24, 16  ;;  %v187_v27 = vshrl.u32 %v185_v25, 16 }
  0x56   : > { %v188_v29 = vxor.u32 %v186_v26, %v184_v24  ;;  %v189_v30 = vxor.u32 %v187_v27, %v185_v25 }
  0x58   : > { %vm198_vm0 = vcmp.ge.u32.totalorder %v188_v29, 2147483648  ;;  %vm199_vm1 = vcmp.ge.u32.totalorder %v189_v30, 2147483648 }
  0x59   : > { %v200_v33 = vsel %vm198_vm0, 2.0, %v597_v32  ;;  %v201_v34 = vsel %vm199_vm1, 2.0, %v597_v32 }
  0x5a   : > { %v204_v35 = vcombine.low %v200_v33, %v201_v34 }
  0x5c   : > { %v211_v36 = vrot.slane %v204_v35, %v210_v31 }
  0x5e   : > { %v219_v39 = vrot.slane %v211_v36, %v210_v31  ;;  %v212_v40 = vcombine.high %v211_v36, %v211_v36 }
  0x60   : > { %v232_v43 = vrot.slane %v219_v39, %v231_v37  ;;  %v236_v44 = vrot.slane %v219_v39, %v235_v38  ;;  %v226_v45 = vrot.slane %v212_v40, %v210_v31  ;;  %v227_v46 = vcombine.high %v219_v39, %v219_v39 }
  0x62   : > { %v269_v49 = vmul.f32 %v232_v43, %v190_v41  ;;  %v270_v50 = vmul.f32 %v236_v44, %v191_v42  ;;  %v240_v51 = vrot.slane %v226_v45, %v231_v37  ;;  %v244_v52 = vrot.slane %v226_v45, %v235_v38 }
  0x63   : > { %v248_v55 = vrot.slane %v227_v46, %v231_v37  ;;  %v252_v56 = vrot.slane %v227_v46, %v235_v38  ;;  %v228_v57 = vcombine.high %v226_v45, %v226_v45 }
  0x64   : > { %277 = vst [vmem:[%s750_s22] sm:$0xff] %v269_v49  ;;  %278 = vst [vmem:[%s750_s22 + $0x8] sm:$0xff] %v270_v50  ;;  %v271_v58 = vmul.f32 %v240_v51, %v192_v47  ;;  %v272_v59 = vmul.f32 %v244_v52, %v193_v48 }
  0x65   : > { %v273_v62 = vmul.f32 %v248_v55, %v194_v53  ;;  %v274_v63 = vmul.f32 %v252_v56, %v195_v54  ;;  %v256_v0 = vrot.slane %v228_v57, %v231_v37  ;;  %v260_v1 = vrot.slane %v228_v57, %v235_v38 }
  0x66   : > { %279 = vst [vmem:[%s750_s22 + $0x10] sm:$0xff] %v271_v58  ;;  %280 = vst [vmem:[%s750_s22 + $0x18] sm:$0xff] %v272_v59 }
  0x67   : > { %281 = vst [vmem:[%s750_s22 + $0x20] sm:$0xff] %v273_v62  ;;  %282 = vst [vmem:[%s750_s22 + $0x28] sm:$0xff] %v274_v63  ;;  %v275_v2 = vmul.f32 %v256_v0, %v196_v60  ;;  %v276_v3 = vmul.f32 %v260_v1, %v197_v61 }
  0x69   : > { %283 = vst [vmem:[%s750_s22 + $0x30] sm:$0xff] %v275_v2  ;;  %284 = vst [vmem:[%s750_s22 + $0x38] sm:$0xff] %v276_v3 }
  0x6a   : > { %522 = shalt.err (!%p519_p5)
}
  0x6b   : > { %s523_s28 = scalar_lea.hbm %s769_s14, 1024  ;;  %s527_s8 = scalar_lea.hbm %s822_s2, 2048 }
  0x6c   : > { %p524_p4 = scmp.ne.s32.totalorder %s769_s14, %s523_s28  ;;  %p528_p12 = scmp.lt.u32.totalorder %s769_s14, %s822_s2 }
  0x6d   : > { %p529_p1 = scmp.lt.u32.totalorder %s527_s8, %s523_s28  ;;  %p531_p8 = scmp.lt.u32.totalorder %s523_s28, %s769_s14 }
  0x6e   : > { %p525_p7 = pnand %p524_p4, %p830_p9 }
  0x6f   : > { %p530_p3 = por %p529_p1, %p528_p12 }
  0x70   : > { %p526_p10 = pneg %p525_p7 }
  0x71   : > { %p532_p11 = por %p531_p8, %p530_p3 }
  0x73   : > { %p533_p0 = pnand %p532_p11, %p526_p10 }
  0x75   : > { %536 = shalt.err (!%p533_p0)
}
  0x76   : > { %s599_s5 = smov 256   ;;  %s600_s6 = smov 16  }
  0x77   : > { %413 = dma.vmem_to_hbm [thread:$0]  (%p830_p9), %s760_s7, 1024, %s769_s14, %s286_s19, %s599_s5, %s599_s5, %s600_s6  }
  0x78 PF: > { %s317_s22 = sand.u32 1, %s571_s11   ;;  %p831_p6 = scmp.ne.s32.totalorder %s827_s25, 0 }
  0x79   : > { %p832_p13 = scmp.ge.s32.totalorder %s591_s16, 2  ;;  %s318_s10 = scalar_lea.sflag [#allocation6], %s317_s22 }
  0x7b   : > { %p420_p2 = pnand %p832_p13, %p831_p6 }
  0x7d   : > { %566 = dma.done.wait (!%p420_p2), %s318_s10, 1024  }
  0x7e   : > { %568 = vsyncadd (!%p420_p2), %s318_s10, 4294966272  ;;  %s19_s16 = sadd.s32 1, %s591_s16   ;;  %s833_s11 = smov %s575_s12 }
  0x7f   : > { %p16_p5 = scmp.ge.s32.totalorder %s19_s16, 4   ;;  %s834_s12 = smov %s579_s13 }
  0x80   : > { %s835_s13 = smov %s675_s24  ;;  %s836_s14 = smov %s587_s15 }
  0x81   : > { %s837_s15 = smov %s839_s18  ;;  %18 = sbr.rel (!%p16_p5) target bundleno = 8 (0x8), region = 69 }
  0x88   :  { %323 = vsyncpa [#allocation5], 1 }
  0x89   :  { %325 = vsyncpa [#allocation5 + $0x1], 1 }
  0x8a   :  { %326 = vsyncpa [#allocation6], 1 }
  0x8b   :  { %328 = vsyncpa [#allocation6 + $0x1], 1 }

</bundles_post_ra>
